<compile_context>
chip_gen: v7x
topology: tpu7x:2x2x1
jax: 0.10.0
libtpu: 0.0.40
codegen_flags: <defaults>
</compile_context>

<pallas_src>
import functools

import jax
import jax.numpy as jnp
from jax.experimental import pallas as pl
from jax.experimental.pallas import tpu as pltpu

_LANES = 128
_SUBLANES = 8


def _round_up(a, b):
    return (a + b - 1) // b * b


def _num_tensorcores():
    """TensorCores addressable by a 'parallel' grid axis on the local chip."""
    try:
        kind = jax.devices()[0].device_kind.lower()
    except Exception:
        return 1
    # v4 / v5p (megacore) and v7x expose 2 TensorCores; v5e / v6e expose 1.
    if "v4" in kind or "v5p" in kind or "v7" in kind:
        return 2
    return 1


def _weighted_mse_kernel(wtab_ref, n_ref, x_ref, t_ref, idx_ref, out_ref, *,
                         tiles_per_core, tiles_total):
    c = pl.program_id(0)
    i = pl.program_id(1)

    @pl.when(i == 0)
    def _init():
        out_ref[...] = jnp.zeros_like(out_ref)

    x = x_ref[...]                                  # (tile_m, 128) f32
    t = t_ref[...]                                  # (tile_m, 128) f32
    idx = idx_ref[...].astype(jnp.int32)            # packed 2*range + gender_bit

    # Combined (range, gender) weight lookup: K2-1 deep compare+select chain over SMEM
    # scalars (no one-hot temporaries, no XLU work).
    # TODO(synk): PyTorch's dict lookup raises KeyError on unknown labels; out-of-range
    # labels here silently fall back to wtab[0].
    k2 = wtab_ref.shape[0]
    w = jnp.full(x.shape, wtab_ref[0], dtype=jnp.float32)
    for k in range(1, k2):
        w = jnp.where(idx == k, wtab_ref[k], w)

    diff = x - t
    wse = diff * diff * w                           # weighted squared error, f32

    tile_m = x.shape[0]
    logical_block = c * tiles_per_core + i          # logical row-block (pre-clamp)
    is_tail = logical_block >= tiles_total - 1      # only the last block can hold padding
                                                    # (or be a clamped duplicate)

    @pl.when(jnp.logical_not(is_tail))
    def _accumulate_full():
        # In-register reduce to (8, 128): same VALU adds, no full-tile accumulator ld/st.
        out_ref[...] += wse.reshape(tile_m // _SUBLANES, _SUBLANES, _LANES).sum(axis=0)

    @pl.when(is_tail)
    def _accumulate_masked():
        # Mask everything at/after the true element count (tail pad, partial boundary
        # block, clamped duplicate blocks).  int32 indexing: supports up to ~2^31 elems.
        row = jax.lax.broadcasted_iota(jnp.int32, wse.shape, 0)
        lane = jax.lax.broadcasted_iota(jnp.int32, wse.shape, 1)
        gidx = logical_block * (tile_m * _LANES) + row * _LANES + lane
        masked = jnp.where(gidx < n_ref[0], wse, 0.0)
        out_ref[...] += masked.reshape(tile_m // _SUBLANES, _SUBLANES, _LANES).sum(axis=0)


def weighted_mse_loss2(inputs, targets, ranges, genders, range_table, gender_table,
                       *, max_tile_rows=4096):
    """inputs/targets/genders: (N,); ranges: (N,) integer labels in [0, K);
    range_table: (K,) f32 indexed by label; gender_table: (2,) f32 = [male, female]."""
    n = int(inputs.shape[0])
    k = int(range_table.shape[0])

    # Combined weight table indexed by idx = 2*range + (gender > 0.5).
    #   wtab[2r + 0] = range_w[r] * female_w,  wtab[2r + 1] = range_w[r] * male_w
    gvec = jnp.stack([gender_table[1], gender_table[0]]).astype(jnp.float32)  # [female, male]
    wtab = (range_table.astype(jnp.float32)[:, None] * gvec[None, :]).reshape(2 * k)

    idx_dtype = jnp.int8 if 2 * k <= 127 else jnp.int32
    # Tiny label prepass (reads ranges+genders once, writes 1 B/elem): moves the gender
    # branch out of the kernel and shrinks label HBM traffic from 8 B/elem to 1 B/elem.
    idx = (ranges.astype(jnp.int32) * 2
           + (genders > 0.5).astype(jnp.int32)).astype(idx_dtype)

    # ---- lane/sublane-dense layout: (rows, 128), rows a multiple of 8 -----------------
    # If n is already a multiple of 1024 the reshape is a free bitcast (no HBM copy);
    # otherwise only the tail is padded.
    # TODO(synk): a manual-DMA path (memory_space=pl.ANY) would avoid even the tail-pad
    # copy for non-aligned n.
    n_pad = _round_up(max(n, 1), _SUBLANES * _LANES)
    rows = n_pad // _LANES

    def as_rows(a, dtype):
        a = a.astype(dtype)
        if n_pad != n:
            a = jnp.pad(a, (0, n_pad - n))
        return a.reshape(rows, _LANES)

    x2 = as_rows(inputs, jnp.float32)
    t2 = as_rows(targets, jnp.float32)
    i2 = as_rows(idx, idx_dtype)

    # ---- tiling / grid -----------------------------------------------------------------
    max_tile_rows = max(_SUBLANES, _round_up(max_tile_rows, 32))
    tile_m = min(max_tile_rows, rows)            # rows is a multiple of 8 -> tile_m is too
    tiles_total = pl.cdiv(rows, tile_m)
    num_cores = _num_tensorcores()
    tiles_per_core = pl.cdiv(tiles_total, num_cores)
    last_block = tiles_total - 1

    def in_spec():
        # Clamp the block index so per-core over-allocation never DMAs out of bounds;
        # clamped duplicates are fully masked in-kernel via the logical block index.
        return pl.BlockSpec(
            (tile_m, _LANES),
            lambda c, i, *_: (jnp.minimum(c * tiles_per_core + i, last_block), 0))

    # VMEM budget derived from the tile: double-buffered input streams + elementwise
    # intermediates + slack (stays well under v7x's 64 MiB physical VMEM).
    idx_bytes = jnp.dtype(idx_dtype).itemsize
    block_bytes = tile_m * _LANES * (4 + 4 + idx_bytes)
    vmem_limit = int(min(2 * block_bytes + 8 * tile_m * _LANES * 4 + (4 << 20), 96 << 20))

    kernel = functools.partial(_weighted_mse_kernel,
                               tiles_per_core=tiles_per_core,
                               tiles_total=tiles_total)

    partials = pl.pallas_call(
        kernel,
        out_shape=jax.ShapeDtypeStruct((num_cores * _SUBLANES, _LANES), jnp.float32),
        grid_spec=pltpu.PrefetchScalarGridSpec(
            num_scalar_prefetch=2,                       # wtab, n -> SMEM
            grid=(num_cores, tiles_per_core),
            in_specs=[in_spec(), in_spec(), in_spec()],
            out_specs=pl.BlockSpec((_SUBLANES, _LANES), lambda c, i, *_: (c, 0)),
        ),
        compiler_params=pltpu.CompilerParams(
            dimension_semantics=("parallel", "arbitrary"),
            vmem_limit_bytes=vmem_limit,
        ),
    )(wtab, jnp.asarray([n], dtype=jnp.int32), x2, t2, i2)

    # Invalid / padded elements were masked to exactly 0, so a plain sum is exact.
    return jnp.sum(partials) / jnp.float32(n)


def _reference(inputs, targets, ranges, genders, range_table, gender_table):
    loss = (inputs - targets) ** 2
    w_range = range_table[ranges]
    w_gender = jnp.where(genders > 0.5, gender_table[0], gender_table[1])
    return jnp.mean(loss * w_range * w_gender)


if __name__ == "__main__":
    # Deterministic "dict" weights (module __init__ takes range_weights / gender_weights dicts).
    range_weights_dict = {"0": 1.0, "1": 2.0, "2": 0.5, "3": 1.5}
    gender_weights_dict = {"male": 0.8, "female": 1.2}

    range_table = jnp.array(
        [range_weights_dict[str(kk)] for kk in range(len(range_weights_dict))],
        dtype=jnp.float32,
    )                                                              # (4,)
    gender_table = jnp.array(
        [gender_weights_dict["male"], gender_weights_dict["female"]],
        dtype=jnp.float32,
    )                                                              # (2,) = [male, female]

    key = jax.random.PRNGKey(0)
    k1, k2, k3, k4 = jax.random.split(key, 4)
    N = 200
    inputs = jax.random.normal(k1, (N,), dtype=jnp.float32)
    targets = jax.random.normal(k2, (N,), dtype=jnp.float32)
    ranges = jax.random.randint(k3, (N,), 0, range_table.shape[0], dtype=jnp.int32)
    genders = jax.random.uniform(k4, (N,), dtype=jnp.float32)

    out = weighted_mse_loss2(inputs, targets, ranges, genders, range_table, gender_table)
    out = jax.block_until_ready(out)

    ref = _reference(inputs, targets, ranges, genders, range_table, gender_table)
    assert jnp.allclose(out, ref, rtol=1e-5, atol=1e-6), (out, ref)
    print("KERNEL_OK")
</pallas_src>

<mosaic_0001>
module attributes {stable_mosaic.version = 11 : i64} {
  func.func @_weighted_mse_kernel(%arg0: i32, %arg1: i32, %arg2: memref<8xf32, #tpu.memory_space<smem>>, %arg3: memref<1xi32, #tpu.memory_space<smem>>, %arg4: memref<8x128xf32, #tpu.memory_space<vmem>>, %arg5: memref<8x128xf32, #tpu.memory_space<vmem>>, %arg6: memref<8x128xi8, #tpu.memory_space<vmem>>, %arg7: memref<8x128xf32, #tpu.memory_space<vmem>>) attributes {dimension_semantics = [#tpu.dimension_semantics<parallel>, #tpu.dimension_semantics<arbitrary>], iteration_bounds = array<i64: 1, 1>, scalar_prefetch = 2 : i64, scratch_operands = 0 : i64, tpu.core_type = #tpu.core_type<tc>, window_params = [{transform_indices = @transform_0, window_bounds = array<i64: 8, 128>}, {transform_indices = @transform_1, window_bounds = array<i64: 8, 128>}, {transform_indices = @transform_2, window_bounds = array<i64: 8, 128>}, {transform_indices = @transform_3, window_bounds = array<i64: 8, 128>}]} {
    %c0_i32 = arith.constant 0 : i32
    %0 = arith.cmpi eq, %arg1, %c0_i32 : i32
    %1 = arith.extui %0 : i1 to i32
    %c0_i32_0 = arith.constant 0 : i32
    %2 = arith.cmpi ne, %1, %c0_i32_0 : i32
    scf.if %2 {
      %cst = arith.constant 0.000000e+00 : f32
      %55 = vector.broadcast %cst : f32 to vector<8x128xf32>
      %c0_11 = arith.constant 0 : index
      %c0_12 = arith.constant 0 : index
      %56 = vector.load %arg7[%c0_11, %c0_12] : memref<8x128xf32, #tpu.memory_space<vmem>>, vector<8x128xf32>
      tpu.vector_store %arg7[%c0_11, %c0_12], %55 {strides = array<i32>} : memref<8x128xf32, #tpu.memory_space<vmem>>, vector<8x128xf32>,
    } else {
    }
    %c0 = arith.constant 0 : index
    %c0_1 = arith.constant 0 : index
    %3 = vector.load %arg4[%c0, %c0_1] : memref<8x128xf32, #tpu.memory_space<vmem>>, vector<8x128xf32>
    %c0_2 = arith.constant 0 : index
    %c0_3 = arith.constant 0 : index
    %4 = vector.load %arg5[%c0_2, %c0_3] : memref<8x128xf32, #tpu.memory_space<vmem>>, vector<8x128xf32>
    %c0_4 = arith.constant 0 : index
    %c0_5 = arith.constant 0 : index
    %5 = vector.load %arg6[%c0_4, %c0_5] : memref<8x128xi8, #tpu.memory_space<vmem>>, vector<8x128xi8>
    %6 = arith.extsi %5 : vector<8x128xi8> to vector<8x128xi32>
    %c0_6 = arith.constant 0 : index
    %7 = memref.load %arg2[%c0_6] : memref<8xf32, #tpu.memory_space<smem>>
    %8 = vector.broadcast %7 : f32 to vector<8x128xf32>
    %c1_i32 = arith.constant 1 : i32
    %9 = vector.broadcast %c1_i32 : i32 to vector<8x128xi32>
    %10 = arith.cmpi eq, %6, %9 : vector<8x128xi32>
    %c1 = arith.constant 1 : index
    %11 = memref.load %arg2[%c1] : memref<8xf32, #tpu.memory_space<smem>>
    %12 = vector.broadcast %11 : f32 to vector<8x128xf32>
    %13 = arith.select %10, %12, %8 : vector<8x128xi1>, vector<8x128xf32>
    %c2_i32 = arith.constant 2 : i32
    %14 = vector.broadcast %c2_i32 : i32 to vector<8x128xi32>
    %15 = arith.cmpi eq, %6, %14 : vector<8x128xi32>
    %c2 = arith.constant 2 : index
    %16 = memref.load %arg2[%c2] : memref<8xf32, #tpu.memory_space<smem>>
    %17 = vector.broadcast %16 : f32 to vector<8x128xf32>
    %18 = arith.select %15, %17, %13 : vector<8x128xi1>, vector<8x128xf32>
    %c3_i32 = arith.constant 3 : i32
    %19 = vector.broadcast %c3_i32 : i32 to vector<8x128xi32>
    %20 = arith.cmpi eq, %6, %19 : vector<8x128xi32>
    %c3 = arith.constant 3 : index
    %21 = memref.load %arg2[%c3] : memref<8xf32, #tpu.memory_space<smem>>
    %22 = vector.broadcast %21 : f32 to vector<8x128xf32>
    %23 = arith.select %20, %22, %18 : vector<8x128xi1>, vector<8x128xf32>
    %c4_i32 = arith.constant 4 : i32
    %24 = vector.broadcast %c4_i32 : i32 to vector<8x128xi32>
    %25 = arith.cmpi eq, %6, %24 : vector<8x128xi32>
    %c4 = arith.constant 4 : index
    %26 = memref.load %arg2[%c4] : memref<8xf32, #tpu.memory_space<smem>>
    %27 = vector.broadcast %26 : f32 to vector<8x128xf32>
    %28 = arith.select %25, %27, %23 : vector<8x128xi1>, vector<8x128xf32>
    %c5_i32 = arith.constant 5 : i32
    %29 = vector.broadcast %c5_i32 : i32 to vector<8x128xi32>
    %30 = arith.cmpi eq, %6, %29 : vector<8x128xi32>
    %c5 = arith.constant 5 : index
    %31 = memref.load %arg2[%c5] : memref<8xf32, #tpu.memory_space<smem>>
    %32 = vector.broadcast %31 : f32 to vector<8x128xf32>
    %33 = arith.select %30, %32, %28 : vector<8x128xi1>, vector<8x128xf32>
    %c6_i32 = arith.constant 6 : i32
    %34 = vector.broadcast %c6_i32 : i32 to vector<8x128xi32>
    %35 = arith.cmpi eq, %6, %34 : vector<8x128xi32>
    %c6 = arith.constant 6 : index
    %36 = memref.load %arg2[%c6] : memref<8xf32, #tpu.memory_space<smem>>
    %37 = vector.broadcast %36 : f32 to vector<8x128xf32>
    %38 = arith.select %35, %37, %33 : vector<8x128xi1>, vector<8x128xf32>
    %c7_i32 = arith.constant 7 : i32
    %39 = vector.broadcast %c7_i32 : i32 to vector<8x128xi32>
    %40 = arith.cmpi eq, %6, %39 : vector<8x128xi32>
    %c7 = arith.constant 7 : index
    %41 = memref.load %arg2[%c7] : memref<8xf32, #tpu.memory_space<smem>>
    %42 = vector.broadcast %41 : f32 to vector<8x128xf32>
    %43 = arith.select %40, %42, %38 : vector<8x128xi1>, vector<8x128xf32>
    %44 = arith.subf %3, %4 : vector<8x128xf32>
    %45 = arith.mulf %44, %44 : vector<8x128xf32>
    %46 = arith.mulf %45, %43 : vector<8x128xf32>
    %c1_i32_7 = arith.constant 1 : i32
    %47 = arith.muli %arg0, %c1_i32_7 : i32
    %48 = arith.addi %47, %arg1 : i32
    %c0_i32_8 = arith.constant 0 : i32
    %49 = arith.cmpi sge, %48, %c0_i32_8 : i32
    %true = arith.constant true
    %50 = arith.xori %49, %true : i1
    %51 = arith.extui %50 : i1 to i32
    %c0_i32_9 = arith.constant 0 : i32
    %52 = arith.cmpi ne, %51, %c0_i32_9 : i32
    scf.if %52 {
      %c0_11 = arith.constant 0 : index
      %c0_12 = arith.constant 0 : index
      %55 = vector.load %arg7[%c0_11, %c0_12] : memref<8x128xf32, #tpu.memory_space<vmem>>, vector<8x128xf32>
      %56 = vector.shape_cast %46 : vector<8x128xf32> to vector<1x8x128xf32>
      %cst = arith.constant dense<0.000000e+00> : vector<8x128xf32>
      %57 = vector.multi_reduction <add>, %56, %cst [0] : vector<1x8x128xf32> to vector<8x128xf32>
      %58 = arith.addf %55, %57 : vector<8x128xf32>
      %c0_13 = arith.constant 0 : index
      %c0_14 = arith.constant 0 : index
      %59 = vector.load %arg7[%c0_13, %c0_14] : memref<8x128xf32, #tpu.memory_space<vmem>>, vector<8x128xf32>
      tpu.vector_store %arg7[%c0_13, %c0_14], %58 {strides = array<i32>} : memref<8x128xf32, #tpu.memory_space<vmem>>, vector<8x128xf32>,
    } else {
    }
    %53 = arith.extui %49 : i1 to i32
    %c0_i32_10 = arith.constant 0 : i32
    %54 = arith.cmpi ne, %53, %c0_i32_10 : i32
    scf.if %54 {
      %55 = tpu.iota {dimensions = array<i32: 0>} : vector<8x128xi32>
      %56 = tpu.iota {dimensions = array<i32: 1>} : vector<8x128xi32>
      %c1024_i32 = arith.constant 1024 : i32
      %57 = arith.muli %48, %c1024_i32 : i32
      %c128_i32 = arith.constant 128 : i32
      %58 = vector.broadcast %c128_i32 : i32 to vector<8x128xi32>
      %59 = arith.muli %55, %58 : vector<8x128xi32>
      %60 = vector.broadcast %57 : i32 to vector<8x128xi32>
      %61 = arith.addi %60, %59 : vector<8x128xi32>
      %62 = arith.addi %61, %56 : vector<8x128xi32>
      %c0_11 = arith.constant 0 : index
      %63 = memref.load %arg3[%c0_11] : memref<1xi32, #tpu.memory_space<smem>>
      %64 = vector.broadcast %63 : i32 to vector<8x128xi32>
      %65 = arith.cmpi slt, %62, %64 : vector<8x128xi32>
      %cst = arith.constant 0.000000e+00 : f32
      %66 = vector.broadcast %cst : f32 to vector<8x128xf32>
      %67 = arith.select %65, %46, %66 : vector<8x128xi1>, vector<8x128xf32>
      %c0_12 = arith.constant 0 : index
      %c0_13 = arith.constant 0 : index
      %68 = vector.load %arg7[%c0_12, %c0_13] : memref<8x128xf32, #tpu.memory_space<vmem>>, vector<8x128xf32>
      %69 = vector.shape_cast %67 : vector<8x128xf32> to vector<1x8x128xf32>
      %cst_14 = arith.constant dense<0.000000e+00> : vector<8x128xf32>
      %70 = vector.multi_reduction <add>, %69, %cst_14 [0] : vector<1x8x128xf32> to vector<8x128xf32>
      %71 = arith.addf %68, %70 : vector<8x128xf32>
      %c0_15 = arith.constant 0 : index
      %c0_16 = arith.constant 0 : index
      %72 = vector.load %arg7[%c0_15, %c0_16] : memref<8x128xf32, #tpu.memory_space<vmem>>, vector<8x128xf32>
      tpu.vector_store %arg7[%c0_15, %c0_16], %71 {strides = array<i32>} : memref<8x128xf32, #tpu.memory_space<vmem>>, vector<8x128xf32>,
    } else {
    }
    return
  }
  func.func @transform_0(%arg0: i32, %arg1: i32, %arg2: memref<8xf32, #tpu.memory_space<smem>>, %arg3: memref<1xi32, #tpu.memory_space<smem>>) -> (i32, i32) {
    %c1_i32 = arith.constant 1 : i32
    %0 = arith.muli %arg0, %c1_i32 : i32
    %1 = arith.addi %0, %arg1 : i32
    %c0_i32 = arith.constant 0 : i32
    %2 = arith.minsi %1, %c0_i32 : i32
    %c0_i32_0 = arith.constant 0 : i32
    %c0_i32_1 = arith.constant 0 : i32
    return %2, %c0_i32_0 : i32, i32
  }
  func.func @transform_1(%arg0: i32, %arg1: i32, %arg2: memref<8xf32, #tpu.memory_space<smem>>, %arg3: memref<1xi32, #tpu.memory_space<smem>>) -> (i32, i32) {
    %c1_i32 = arith.constant 1 : i32
    %0 = arith.muli %arg0, %c1_i32 : i32
    %1 = arith.addi %0, %arg1 : i32
    %c0_i32 = arith.constant 0 : i32
    %2 = arith.minsi %1, %c0_i32 : i32
    %c0_i32_0 = arith.constant 0 : i32
    %c0_i32_1 = arith.constant 0 : i32
    return %2, %c0_i32_0 : i32, i32
  }
  func.func @transform_2(%arg0: i32, %arg1: i32, %arg2: memref<8xf32, #tpu.memory_space<smem>>, %arg3: memref<1xi32, #tpu.memory_space<smem>>) -> (i32, i32) {
    %c1_i32 = arith.constant 1 : i32
    %0 = arith.muli %arg0, %c1_i32 : i32
    %1 = arith.addi %0, %arg1 : i32
    %c0_i32 = arith.constant 0 : i32
    %2 = arith.minsi %1, %c0_i32 : i32
    %c0_i32_0 = arith.constant 0 : i32
    %c0_i32_1 = arith.constant 0 : i32
    return %2, %c0_i32_0 : i32, i32
  }
  func.func @transform_3(%arg0: i32, %arg1: i32, %arg2: memref<8xf32, #tpu.memory_space<smem>>, %arg3: memref<1xi32, #tpu.memory_space<smem>>) -> (i32, i32) {
    %c0_i32 = arith.constant 0 : i32
    %c0_i32_0 = arith.constant 0 : i32
    return %arg0, %c0_i32 : i32, i32
  }
}

</mosaic_0001>

<bundles_post_ra>
// kernel: tpu_custom_call.1
= control target key start
LH: loop header
LB: loop body
LE: loop exit
PB: predicated region body
PF: predicated region fallthrough
CT: control target
= control target key end

     0   :  { %s350_s0 = inlined_call_operand.vmem [shape: f32[8], index: 0, kind: input, shape index: {}]   ;;  %s351_s1 = inlined_call_operand.<no memory space> [shape: s32[1], index: 1, kind: input, shape index: {}]   ;;  %s352_s2 = inlined_call_operand.hbm [shape: f32[8,128], index: 2, kind: input, shape index: {}]   ;;  %s353_s3 = inlined_call_operand.vmem [shape: f32[8,128], index: 3, kind: input, shape index: {}]   ;;  %s354_s4 = inlined_call_operand.vmem [shape: s8[8,128], index: 4, kind: input, shape index: {}]   ;;  %s355_s5 = inlined_call_operand.hbm [shape: f32[8,128], index: 5, kind: output, shape index: {}]  }
   0x1   :  { %s10_s20 = sshll.u32 %s350_s0, 4  ;;  %s11_s20 = int_to_ptr.vmem [resolvable:$true] %s10_s20 }
   0x2   :  { %s210_s21 = scalar_lea.vmem %s11_s20, 16  ;;  %p215_p1 = scmp.lt.s32.totalorder %s11_s20, %s11_s20 }
   0x3   :  { %p211_p0 = scmp.ne.s32.totalorder %s11_s20, %s210_s21  ;;  %p216_p2 = scmp.lt.s32.totalorder %s210_s21, %s210_s21 }
   0x5   :  { %p217_p3 = por %p216_p2, %p215_p1 }
   0x7   :  { %p218_p4 = pnand %p217_p3, %p211_p0 }
   0x9   :  { %221 = shalt.err (!%p218_p4)  }
   0xa   :  { %s272_s22 = smov [#allocation3]  }
   0xb   :  { %13 = dma.vmem_to_smem %s11_s20, 16, %s272_s22, [#allocation2] }
   0xc   :  { %266 = dma.done.wait [#allocation2], 16 }
   0xd   :  { %267 = vsyncadd [#allocation2], 4294967280 }
   0xe   :  { %16 = sfence }
   0xf   :  { %17 = vsyncpa [#allocation6], 0 }
  0x10   :  { %18 = vsyncpa [#allocation7], 0  ;;  %s273_s23 = smov [#allocation5]   ;;  %s222_s26 = scalar_lea.hbm %s352_s2, 128 }
  0x11   :  { %s30_s24 = sshll.u32 %s273_s23, 4  ;;  %p223_p5 = scmp.ne.s32.totalorder %s352_s2, %s222_s26  ;;  %s31_s24 = int_to_ptr.vmem [resolvable:$true] %s30_s24 }
  0x12   :  { %p226_p6 = scmp.lt.u32.totalorder %s222_s26, %s352_s2 }
  0x14   :  { %p228_p7 = pnand %p226_p6, %p223_p5 }
  0x16   :  { %231 = shalt.err (!%p228_p7)
}
  0x17   :  { %s232_s6 = scalar_lea.vmem %s31_s24, 128  ;;  %p237_p9 = scmp.lt.s32.totalorder %s31_s24, %s31_s24 }
  0x18   :  { %p233_p8 = scmp.ne.s32.totalorder %s31_s24, %s232_s6  ;;  %p238_p10 = scmp.lt.s32.totalorder %s232_s6, %s232_s6 }
  0x1a   :  { %p239_p11 = por %p238_p10, %p237_p9 }
  0x1c   :  { %p240_p12 = pnand %p239_p11, %p233_p8 }
  0x1e   :  { %243 = shalt.err (!%p240_p12)
}
  0x1f   :  { %33 = dma.hbm_to_vmem [thread:$0]  %s352_s2, 128, %s31_s24, [#allocation6]  }
  0x20   :  { %268 = dma.done.wait [#allocation6], 128  }
  0x21   :  { %269 = vsyncadd [#allocation6], 4294967168  ;;  %s107_s9 = sld [smem:[#allocation3]]  ;;  %s199_s10 = sld [smem:[#allocation3 + $0x1]]  ;;  %v153_v0 = vlaneseq  ;;  %v103_v2 = vld [vmem:[#allocation5] sm:$0xff]  ;;  %v163_v17 = vstv %s351_s1 }
  0x22   :  { %s200_s11 = sld [smem:[#allocation3 + $0x2]]  ;;  %s201_s12 = sld [smem:[#allocation3 + $0x3]]  ;;  %v104_v3 = vld [vmem:[%s353_s3] sm:$0xff] }
  0x23   :  { %s202_s13 = sld [smem:[#allocation3 + $0x4]]  ;;  %s320_s14 = sld [smem:[#allocation3 + $0x5]]  ;;  %v154_v1 = vshrl.u32 %v153_v0, 7  ;;  %v105_v4 = vld [vmem:[%s354_s4] sm:$0x3]  ;;  %v156_v10 = vand.u32 127, %v153_v0  ;;  %v137_v12 = vsub.f32 %v103_v2, %v104_v3 }
  0x24   :  { %s322_s15 = sld [smem:[#allocation3 + $0x6]]  ;;  %s324_s16 = sld [smem:[#allocation3 + $0x7]]  ;;  %v106_v5 = vunpack.c.0.s8 %v105_v4 }
  0x25   :  { %v158_v11 = vmul.u32 128, %v154_v1  ;;  %v138_v23 = vmul.f32 %v137_v12, %v137_v12  ;;  %s274_s20 = smov [#allocation8]  }
  0x26   :  { %vm109_vm0 = vcmp.eq.s32.totalorder %v106_v5, 1  ;;  %vm113_vm1 = vcmp.eq.s32.totalorder %v106_v5, 2  ;;  %vm117_vm2 = vcmp.eq.s32.totalorder %v106_v5, 3  ;;  %vm121_vm3 = vcmp.eq.s32.totalorder %v106_v5, 4  ;;  %s176_s21 = sshll.u32 %s274_s20, 4  ;;  %s177_s21 = int_to_ptr.vmem [resolvable:$true] %s176_s21 }
  0x27   :  { %v108_v6 = vstv %s107_s9  ;;  %v111_v7 = vstv %s199_s10  ;;  %vm125_vm4 = vcmp.eq.s32.totalorder %v106_v5, 5  ;;  %vm129_vm5 = vcmp.eq.s32.totalorder %v106_v5, 6  ;;  %s244_s22 = scalar_lea.vmem %s177_s21, 128  ;;  %p249_p0 = scmp.lt.s32.totalorder %s177_s21, %s177_s21 }
  0x28   :  { %v115_v8 = vstv %s200_s11  ;;  %v119_v9 = vstv %s201_s12  ;;  %v112_v13 = vsel %vm109_vm0, %v111_v7, %v108_v6  ;;  %v161_v20 = vadd.s32 %v158_v11, %v156_v10  ;;  %p245_p13 = scmp.ne.s32.totalorder %s177_s21, %s244_s22  ;;  %p250_p1 = scmp.lt.s32.totalorder %s244_s22, %s244_s22 }
  0x29   :  { %v123_v14 = vstv %s202_s13  ;;  %v116_v15 = vsel %vm113_vm1, %v115_v8, %v112_v13  ;;  %v127_v16 = vstv %s320_s14  ;;  %vm133_vm6 = vcmp.eq.s32.totalorder %v106_v5, 7 }
  0x2a   :  { %v120_v18 = vsel %vm117_vm2, %v119_v9, %v116_v15  ;;  %v131_v19 = vstv %s322_s15  ;;  %v135_v22 = vstv %s324_s16  ;;  %vm164_vm7 = vcmp.lt.s32.totalorder %v161_v20, %v163_v17  ;;  %p251_p2 = por %p250_p1, %p249_p0 }
  0x2b   :  { %v124_v21 = vsel %vm121_vm3, %v123_v14, %v120_v18 }
  0x2c   :  { %v128_v24 = vsel %vm125_vm4, %v127_v16, %v124_v21  ;;  %p252_p3 = pnand %p251_p2, %p245_p13 }
  0x2d   :  { %v132_v25 = vsel %vm129_vm5, %v131_v19, %v128_v24 }
  0x2e   :  { %v136_v26 = vsel %vm133_vm6, %v135_v22, %v132_v25 }
  0x2f   :  { %v139_v27 = vmul.f32 %v138_v23, %v136_v26 }
  0x31   :  { %v165_v28 = vsel %vm164_vm7, %v139_v27, 0.0 }
  0x32   :  { %169 = vst [vmem:[#allocation8] sm:$0xff] %v165_v28 }
  0x33   :  { %255 = shalt.err (!%p252_p3)
}
  0x34   :  { %s256_s24 = scalar_lea.hbm %s355_s5, 128 }
  0x35   :  { %p257_p4 = scmp.ne.s32.totalorder %s355_s5, %s256_s24  ;;  %p260_p5 = scmp.lt.u32.totalorder %s256_s24, %s355_s5 }
  0x37   :  { %p262_p6 = pnand %p260_p5, %p257_p4 }
  0x39   :  { %265 = shalt.err (!%p262_p6)
}
  0x3a   :  { %179 = dma.vmem_to_hbm [thread:$0]  %s177_s21, 128, %s355_s5, [#allocation7]  }
  0x3b   :  { %270 = dma.done.wait [#allocation7], 128  }
  0x3c   :  { %271 = vsyncadd [#allocation7], 4294967168 }
  0x3d   :  { %183 = vsyncpa [#allocation6], 1 }
  0x3e   :  { %184 = vsyncpa [#allocation7], 1 }

</bundles_post_ra>
